<compile_context>
chip_gen: v7x
topology: tpu7x:2x2x1
jax: 0.10.0
libtpu: 0.0.40
codegen_flags: <defaults>
</compile_context>

<pallas_src>
import functools

import jax
import jax.numpy as jnp
from jax import lax
from jax.experimental import pallas as pl
from jax.experimental.pallas import tpu as pltpu

INV_R = -1.0 / 0.00198720425864083
LB = 1e-06
UB = 10.0
LANES = 128     # batch (lane) axis granularity
SUBLANES = 8    # feature (sublane) axis granularity


def _round_up(x, m):
    return (x + m - 1) // m * m


# ---------------------------------------------------------------------------
# One-time parameter preparation (hoisted out of the per-step RHS path).
# ---------------------------------------------------------------------------
def prepare_params(w_in, w_b, w_out, weight_dtype=jnp.float32):
    """Pad / transpose the NeuralODE weights once, for the (feature, batch) layout.

    w_in: (S+1, M), w_b: (M,), w_out: (S, M).
      w_in_t    : (Mp, Fp) = w_in.T zero-padded       (h  = w_in_t    @ v)
      w_b       : (Mp, 1)  zero-padded bias column
      w_out_pad : (Fp, Mp) = [w_out; 0] zero-padded   (du = w_out_pad @ act)
    Zero padding guarantees padded rows/cols contribute exactly 0; the all-zero
    temperature row of w_out_pad reproduces torch.cat((..., [0.0])) -> dT/dt = 0.
    weight_dtype=jnp.bfloat16 halves resident-weight vregs on v5e/v6e/v7x but
    will not meet the tight f32 reference tolerances, so f32 is the default.
    """
    s1, m = w_in.shape
    fp = _round_up(s1, SUBLANES)     # 9  -> 16 (sublane axis only — NOT 128)
    mp = _round_up(m, SUBLANES)      # 32 -> 32
    w_in_t = jnp.zeros((mp, fp), jnp.float32).at[:m, :s1].set(
        jnp.transpose(w_in).astype(jnp.float32))
    w_b_p = jnp.zeros((mp, 1), jnp.float32).at[:m, 0].set(w_b.astype(jnp.float32))
    w_out_p = jnp.zeros((fp, mp), jnp.float32).at[:s1 - 1, :m].set(
        w_out.astype(jnp.float32))
    return dict(
        w_in_t=w_in_t.astype(weight_dtype),
        w_b=w_b_p,
        w_out_pad=w_out_p.astype(weight_dtype),
        s1=s1, fp=fp, mp=mp,
    )


# ---------------------------------------------------------------------------
# RHS math on one (Fp, Bt) block: feature on sublanes, batch on lanes.
# ---------------------------------------------------------------------------
def _masks(s1, shape):
    row = lax.broadcasted_iota(jnp.int32, shape, 0)
    return row < (s1 - 1), row == (s1 - 1)


def _rhs(u, w_in_t, w_b_bc, w_out_pad, is_species, is_temp, s1):
    # log/clip run on the whole (tiny: 16 x Bt) tile and are discarded on
    # non-species rows by the select; the f32 divide is restricted to the
    # single temperature sublane row.
    log_x = jnp.log(jnp.clip(u, LB, UB))
    inv_rt = INV_R / u[s1 - 1:s1, :]                       # (1, Bt) only
    v = jnp.where(is_species, log_x, 0.0)
    v = jnp.where(is_temp, inv_rt, v)
    h = jnp.dot(w_in_t, v.astype(w_in_t.dtype),
                preferred_element_type=jnp.float32,
                precision=lax.Precision.HIGHEST) + w_b_bc   # MXU #1
    act = jnp.exp(h)                                        # EUP slot
    return jnp.dot(w_out_pad, act.astype(w_out_pad.dtype),
                   preferred_element_type=jnp.float32,
                   precision=lax.Precision.HIGHEST)          # MXU #2


# ---------------------------------------------------------------------------
# Kernel 1: batched RHS evaluation.
# ---------------------------------------------------------------------------
def _rhs_kernel(u_ref, w_in_t_ref, w_b_ref, w_out_ref, du_ref, *, s1):
    fp, bt = u_ref.shape
    mp = w_b_ref.shape[0]
    is_species, is_temp = _masks(s1, (fp, bt))
    w_b_bc = jnp.broadcast_to(w_b_ref[...], (mp, bt))
    du_ref[...] = _rhs(u_ref[...], w_in_t_ref[...], w_b_bc, w_out_ref[...],
                       is_species, is_temp, s1)


# ---------------------------------------------------------------------------
# Kernel 2: fused explicit-Euler integrator (n_steps RHS evals per call).
# ---------------------------------------------------------------------------
def _euler_kernel(u_ref, w_in_t_ref, w_b_ref, w_out_ref, uo_ref, *,
                  s1, n_steps, dt, unroll):
    fp, bt = u_ref.shape
    mp = w_b_ref.shape[0]
    # Loop invariants hoisted out of the serial Euler chain (JAX does not CSE
    # iota / broadcast_in_dim; they would otherwise re-materialize every step).
    w_in_t = w_in_t_ref[...]
    w_out_pad = w_out_ref[...]
    w_b_bc = jnp.broadcast_to(w_b_ref[...], (mp, bt))
    is_species, is_temp = _masks(s1, (fp, bt))

    def step(_, u):
        return u + dt * _rhs(u, w_in_t, w_b_bc, w_out_pad, is_species, is_temp, s1)

    uo_ref[...] = lax.fori_loop(0, n_steps, step, u_ref[...], unroll=unroll)


# ---------------------------------------------------------------------------
# Wrappers: padding, block selection, pallas_call plumbing.
# ---------------------------------------------------------------------------
def _choose_blocks(b, max_block, min_grid):
    g = pl.cdiv(b, LANES)                               # 128-lane groups needed
    n_blocks = min(g, max(min_grid, pl.cdiv(b, max_block)))
    block_b = pl.cdiv(g, n_blocks) * LANES
    bp = n_blocks * block_b
    return bp, block_b


def _pad_state(u_batch, s1, fp, max_block, min_grid):
    b, f = u_batch.shape
    assert f == s1, f"state must have {s1} features, got {f}"
    bp, block_b = _choose_blocks(b, max_block, min_grid)
    # (B, S+1) -> (Fp, Bp): feature on sublanes, batch on lanes.  Edge padding
    # keeps padded rows/columns finite and benign (copies of real states).
    u_t = jnp.transpose(u_batch).astype(jnp.float32)
    u_p = jnp.pad(u_t, ((0, fp - s1), (0, bp - b)), mode="edge")
    return u_p, b, bp, block_b


def _weight_specs(fp, mp):
    # Constant index_maps -> weights are DMA'd once and stay VMEM-resident
    # across all grid steps (a few KiB total; double-buffer cost negligible).
    return [
        pl.BlockSpec((mp, fp), lambda i: (0, 0)),   # w_in_t
        pl.BlockSpec((mp, 1), lambda i: (0, 0)),    # w_b
        pl.BlockSpec((fp, mp), lambda i: (0, 0)),   # w_out_pad
    ]


def neural_ode_rhs_batched(u_batch, params, *, max_block=2048, min_grid=1):
    """du/dt for a batch of states in ONE pallas_call.  u_batch: (B, S+1)."""
    s1, fp, mp = params["s1"], params["fp"], params["mp"]
    u_p, b, bp, block_b = _pad_state(u_batch, s1, fp, max_block, min_grid)
    du_p = pl.pallas_call(
        functools.partial(_rhs_kernel, s1=s1),
        out_shape=jax.ShapeDtypeStruct((fp, bp), jnp.float32),
        grid_spec=pltpu.PrefetchScalarGridSpec(
            num_scalar_prefetch=0,
            grid=(bp // block_b,),
            in_specs=[pl.BlockSpec((fp, block_b), lambda i: (0, i))]
            + _weight_specs(fp, mp),
            out_specs=pl.BlockSpec((fp, block_b), lambda i: (0, i)),
        ),
        compiler_params=pltpu.CompilerParams(
            dimension_semantics=("parallel",),      # v7x: shard batch over 2 TCs
        ),
    )(u_p, params["w_in_t"], params["w_b"], params["w_out_pad"])
    return jnp.transpose(du_p[:s1, :b])


def neural_ode_integrate_euler(u_batch, params, *, dt, n_steps,
                               max_block=2048, min_grid=2, unroll=None):
    """Advance a batch of trajectories n_steps with explicit Euler, fused in-kernel.

    min_grid=2 splits the batch over >=2 grid steps when possible so both v7x
    TensorCores get work (harmless on single-TC v5e/v6e).
    """
    # TODO(synk): higher-order / adaptive solvers need in-kernel step-size
    # control; this fixed-step Euler demonstrates the launch-amortization path.
    s1, fp, mp = params["s1"], params["fp"], params["mp"]
    u_p, b, bp, block_b = _pad_state(u_batch, s1, fp, max_block, min_grid)
    if unroll is None:
        unroll = True if n_steps <= 32 else 8

    cost = pl.CostEstimate(
        flops=int(n_steps * bp * 4 * mp * fp),
        transcendentals=int(n_steps * bp * (mp + fp)),
        bytes_accessed=int(4 * (2 * fp * bp + 2 * mp * fp + mp)),
    )
    uo_p = pl.pallas_call(
        functools.partial(_euler_kernel, s1=s1, n_steps=int(n_steps),
                          dt=float(dt), unroll=unroll),
        out_shape=jax.ShapeDtypeStruct((fp, bp), jnp.float32),
        grid_spec=pltpu.PrefetchScalarGridSpec(
            num_scalar_prefetch=0,
            grid=(bp // block_b,),
            in_specs=[pl.BlockSpec((fp, block_b), lambda i: (0, i))]
            + _weight_specs(fp, mp),
            out_specs=pl.BlockSpec((fp, block_b), lambda i: (0, i)),
        ),
        compiler_params=pltpu.CompilerParams(
            dimension_semantics=("parallel",),
        ),
        input_output_aliases={0: 0},    # state in/out share the HBM buffer
        cost_estimate=cost,
    )(u_p, params["w_in_t"], params["w_b"], params["w_out_pad"])
    return jnp.transpose(uo_p[:s1, :b])


# ---------------------------------------------------------------------------
# Faithful single-state forward (pure JAX — a pallas_call for one 9-vector is
# pure launch overhead; batch states for the Pallas path).  Also the reference.
# ---------------------------------------------------------------------------
def neural_ode_forward(t, u, w_in, w_b, w_out):
    del t  # unused, as in the PyTorch module
    log_x = jnp.log(jnp.clip(u[:-1], LB, UB))
    vec = jnp.concatenate([log_x, INV_R / u[-1:]])
    hidden = jnp.exp(jnp.matmul(w_in.T, vec, precision=lax.Precision.HIGHEST) + w_b)
    du_sp = jnp.matmul(w_out, hidden, precision=lax.Precision.HIGHEST)
    return jnp.concatenate([du_sp, jnp.zeros((1,), du_sp.dtype)])


if __name__ == "__main__":
    S = 8        # species (u has S+1 entries: S species + temperature)
    M = 32       # hidden width (reactions)
    B = 32       # batch of trajectories
    N_STEPS = 16
    DT = 1e-3

    key = jax.random.PRNGKey(0)
    k_u, k_in, k_b, k_out = jax.random.split(key, 4)

    w_in = jax.random.normal(k_in, (S + 1, M), jnp.float32) * 1e-3
    w_b = jax.random.normal(k_b, (M,), jnp.float32) * 0.1
    w_out = jax.random.normal(k_out, (S, M), jnp.float32) * 0.1

    conc = jax.random.uniform(k_u, (B, S), jnp.float32, minval=0.01, maxval=5.0)
    temp = jnp.full((B, 1), 500.0, jnp.float32)
    u_batch = jnp.concatenate([conc, temp], axis=1)      # (B, S+1)

    params = prepare_params(w_in, w_b, w_out)            # one-time prep
    t0 = jnp.float32(0.0)

    # 1) batched RHS: one pallas_call, weights resident, batch on the lane axis
    du_b = jax.block_until_ready(neural_ode_rhs_batched(u_batch, params))
    du_ref = jax.vmap(lambda u: neural_ode_forward(t0, u, w_in, w_b, w_out))(u_batch)
    assert du_b.shape == (B, S + 1)
    assert bool(jnp.all(du_b[:, -1] == 0.0))             # dT/dt is exactly 0
    assert jnp.allclose(du_b, du_ref, rtol=5e-5, atol=1e-5), \
        float(jnp.max(jnp.abs(du_b - du_ref)))

    # 2) single-state semantics (row 0 of the batched Pallas result)
    du0_ref = neural_ode_forward(t0, u_batch[0], w_in, w_b, w_out)
    assert jnp.allclose(du_b[0], du0_ref, rtol=5e-5, atol=1e-5)

    # 3) fused integrator: N_STEPS RHS evaluations inside ONE pallas_call
    uT = jax.block_until_ready(
        neural_ode_integrate_euler(u_batch, params, dt=DT, n_steps=N_STEPS))

    def ref_step(u, _):
        du = jax.vmap(lambda x: neural_ode_forward(t0, x, w_in, w_b, w_out))(u)
        return u + DT * du, None

    uT_ref, _ = lax.scan(ref_step, u_batch, None, length=N_STEPS)
    assert uT.shape == (B, S + 1)
    assert jnp.allclose(uT, uT_ref, rtol=1e-4, atol=1e-5), \
        float(jnp.max(jnp.abs(uT - uT_ref)))

    print("KERNEL_OK")
</pallas_src>

<mosaic_0001>
module attributes {stable_mosaic.version = 11 : i64} {
  func.func @_rhs_kernel(%arg0: i32, %arg1: memref<16x128xf32, #tpu.memory_space<vmem>>, %arg2: memref<32x16xf32, #tpu.memory_space<vmem>>, %arg3: memref<32x1xf32, #tpu.memory_space<vmem>>, %arg4: memref<16x32xf32, #tpu.memory_space<vmem>>, %arg5: memref<16x128xf32, #tpu.memory_space<vmem>>) attributes {dimension_semantics = [#tpu.dimension_semantics<parallel>], iteration_bounds = array<i64: 1>, scalar_prefetch = 0 : i64, scratch_operands = 0 : i64, tpu.core_type = #tpu.core_type<tc>, window_params = [{transform_indices = @transform_0, window_bounds = array<i64: 16, 128>}, {pipeline_mode = #tpu.pipeline_mode<synchronous>, transform_indices = @transform_1, window_bounds = array<i64: 32, 16>}, {pipeline_mode = #tpu.pipeline_mode<synchronous>, transform_indices = @transform_2, window_bounds = array<i64: 32, 1>}, {pipeline_mode = #tpu.pipeline_mode<synchronous>, transform_indices = @transform_3, window_bounds = array<i64: 16, 32>}, {transform_indices = @transform_4, window_bounds = array<i64: 16, 128>}]} {
    %0 = tpu.iota {dimensions = array<i32: 0>} : vector<16x128xi32>
    %c8_i32 = arith.constant 8 : i32
    %1 = vector.broadcast %c8_i32 : i32 to vector<16x128xi32>
    %2 = arith.cmpi slt, %0, %1 : vector<16x128xi32>
    %c8_i32_0 = arith.constant 8 : i32
    %3 = vector.broadcast %c8_i32_0 : i32 to vector<16x128xi32>
    %4 = arith.cmpi eq, %0, %3 : vector<16x128xi32>
    %c0 = arith.constant 0 : index
    %c0_1 = arith.constant 0 : index
    %5 = vector.load %arg3[%c0, %c0_1] : memref<32x1xf32, #tpu.memory_space<vmem>>, vector<32x1xf32>
    %6 = vector.shape_cast %5 : vector<32x1xf32> to vector<32x1xf32>
    %7 = vector.broadcast %6 : vector<32x1xf32> to vector<32x128xf32>
    %c0_2 = arith.constant 0 : index
    %c0_3 = arith.constant 0 : index
    %8 = vector.load %arg1[%c0_2, %c0_3] : memref<16x128xf32, #tpu.memory_space<vmem>>, vector<16x128xf32>
    %c0_4 = arith.constant 0 : index
    %c0_5 = arith.constant 0 : index
    %9 = vector.load %arg2[%c0_4, %c0_5] : memref<32x16xf32, #tpu.memory_space<vmem>>, vector<32x16xf32>
    %c0_6 = arith.constant 0 : index
    %c0_7 = arith.constant 0 : index
    %10 = vector.load %arg4[%c0_6, %c0_7] : memref<16x32xf32, #tpu.memory_space<vmem>>, vector<16x32xf32>
    %cst = arith.constant 9.99999997E-7 : f32
    %cst_8 = arith.constant 1.000000e+01 : f32
    %11 = vector.broadcast %cst : f32 to vector<16x128xf32>
    %12 = arith.maximumf %11, %8 : vector<16x128xf32>
    %13 = vector.broadcast %cst_8 : f32 to vector<16x128xf32>
    %14 = arith.minimumf %13, %12 : vector<16x128xf32>
    %15 = math.log %14 : vector<16x128xf32>
    %16 = vector.extract_strided_slice %8 {offsets = [8, 0], sizes = [1, 128], strides = [1, 1]} : vector<16x128xf32> to vector<1x128xf32>
    %cst_9 = arith.constant -503.219543 : f32
    %17 = vector.broadcast %cst_9 : f32 to vector<1x128xf32>
    %18 = arith.divf %17, %16 : vector<1x128xf32>
    %cst_10 = arith.constant 0.000000e+00 : f32
    %19 = vector.broadcast %cst_10 : f32 to vector<16x128xf32>
    %20 = arith.select %2, %15, %19 : vector<16x128xi1>, vector<16x128xf32>
    %21 = vector.shape_cast %18 : vector<1x128xf32> to vector<1x128xf32>
    %22 = vector.broadcast %21 : vector<1x128xf32> to vector<16x128xf32>
    %23 = arith.select %4, %22, %20 : vector<16x128xi1>, vector<16x128xf32>
    %cst_11 = arith.constant dense<0.000000e+00> : vector<32x128xf32>
    %24 = tpu.matmul %9, %23, %cst_11 {dimension_numbers = #tpu.dot_dimension_numbers<[1], [0], [0], [1], [0, 0, 1, 1], [], []>, precision = #tpu.contract_precision<fp32>} : vector<32x16xf32>, vector<16x128xf32>, vector<32x128xf32> -> vector<32x128xf32>
    %25 = arith.addf %24, %7 : vector<32x128xf32>
    %26 = math.exp %25 : vector<32x128xf32>
    %cst_12 = arith.constant dense<0.000000e+00> : vector<16x128xf32>
    %27 = tpu.matmul %10, %26, %cst_12 {dimension_numbers = #tpu.dot_dimension_numbers<[1], [0], [0], [1], [0, 0, 1, 1], [], []>, precision = #tpu.contract_precision<fp32>} : vector<16x32xf32>, vector<32x128xf32>, vector<16x128xf32> -> vector<16x128xf32>
    %c0_13 = arith.constant 0 : index
    %c0_14 = arith.constant 0 : index
    %28 = vector.load %arg5[%c0_13, %c0_14] : memref<16x128xf32, #tpu.memory_space<vmem>>, vector<16x128xf32>
    tpu.vector_store %arg5[%c0_13, %c0_14], %27 {strides = array<i32>} : memref<16x128xf32, #tpu.memory_space<vmem>>, vector<16x128xf32>,
    return
  }
  func.func @transform_0(%arg0: i32) -> (i32, i32) {
    %c0_i32 = arith.constant 0 : i32
    %c0_i32_0 = arith.constant 0 : i32
    return %c0_i32, %arg0 : i32, i32
  }
  func.func @transform_1(%arg0: i32) -> (i32, i32) {
    %c0_i32 = arith.constant 0 : i32
    %c0_i32_0 = arith.constant 0 : i32
    %c0_i32_1 = arith.constant 0 : i32
    return %c0_i32, %c0_i32_0 : i32, i32
  }
  func.func @transform_2(%arg0: i32) -> (i32, i32) {
    %c0_i32 = arith.constant 0 : i32
    %c0_i32_0 = arith.constant 0 : i32
    %c0_i32_1 = arith.constant 0 : i32
    return %c0_i32, %c0_i32_0 : i32, i32
  }
  func.func @transform_3(%arg0: i32) -> (i32, i32) {
    %c0_i32 = arith.constant 0 : i32
    %c0_i32_0 = arith.constant 0 : i32
    %c0_i32_1 = arith.constant 0 : i32
    return %c0_i32, %c0_i32_0 : i32, i32
  }
  func.func @transform_4(%arg0: i32) -> (i32, i32) {
    %c0_i32 = arith.constant 0 : i32
    %c0_i32_0 = arith.constant 0 : i32
    return %c0_i32, %arg0 : i32, i32
  }
}

</mosaic_0001>

<bundles_post_ra>
// kernel: tpu_custom_call.1
= control target key start
LH: loop header
LB: loop body
LE: loop exit
PB: predicated region body
PF: predicated region fallthrough
CT: control target
= control target key end

     0   :  { %vm75_vm0 = vcmask 130048   ;;  %v18_v3 = vlaneseq  ;;  %v1583_v8 = vmov 0   ;;  %s1720_s0 = inlined_call_operand.vmem [shape: f32[16,128], index: 0, kind: input, shape index: {}]   ;;  %s1721_s1 = inlined_call_operand.vmem [shape: f32[32,16], index: 1, kind: input, shape index: {}]   ;;  %s1722_s2 = inlined_call_operand.vmem [shape: f32[32,1], index: 2, kind: input, shape index: {}]   ;;  %s1723_s3 = inlined_call_operand.vmem [shape: f32[16,32], index: 3, kind: input, shape index: {}]   ;;  %s1724_s4 = inlined_call_operand.hbm [shape: f32[16,128], index: 4, kind: output, shape index: {}]  }
   0x1   :  { %v49_v0 = vld [vmem:[%s1720_s0] sm:$0xff]  ;;  %v50_v1 = vld [vmem:[%s1720_s0 + $0x8] sm:$0xff]  ;;  %v53_v7 = vld [vmem:[%s1721_s1 + $0x10] sm:$0xff]  ;;  %1545 = vset.pattern.permute.xlu0 %v1583_v8  ;;  %1546 = vset.pattern.permute.xlu1 %v1583_v8 }
   0x2   :  { %v51_v2 = vld [vmem:[%s1721_s1] sm:$0xff]  ;;  %v57_v4 = vmax.f32 %v49_v0, 1e-06  ;;  %1547 = vrcp.f32 %v50_v1  ;;  %v52_v6 = vld [vmem:[%s1721_s1 + $0x8] sm:$0xff]  ;;  %v27_v11 = vld [vmem:[%s1722_s2 + $0x10] sm:$0xff]  ;;  %v83_v16 = vsel %vm75_vm0, %v53_v7, 0 }
   0x3   :  { %v77_v5 = vsel %vm75_vm0, %v51_v2, 0  ;;  %v25_v10 = vld [vmem:[%s1722_s2] sm:$0xff]  ;;  %v80_v13 = vsel %vm75_vm0, %v52_v6, 0  ;;  %v54_v14 = vld [vmem:[%s1721_s1 + $0x18] sm:$0xff]  ;;  %41 = vperm.xlu1 %1546, %v27_v11   ;;  %v26_v17 = vld [vmem:[%s1722_s2 + $0x8] sm:$0xff] }
   0x4   :  { %v1628_v9 = vand.u32 4294901760, %v77_v5  ;;  %v59_v12 = vmin.f32 %v57_v4, 10.0  ;;  %31 = vperm.xlu0 %1545, %v25_v10   ;;  %v28_v18 = vld [vmem:[%s1722_s2 + $0x18] sm:$0xff] }
   0x6   :  { %v1641_v15 = vsub.f32 %v77_v5, %v1628_v9 }
   0x7   :  { %9 = vsyncpa [#allocation3], 0  ;;  %v19_v19 = vshrl.u32 %v18_v3, 7  ;;  %1549 = vlog2.f32 %v59_v12  ;;  %v1651_v21 = vand.u32 4294901760, %v80_v13  ;;  %v1653_v22 = vand.u32 4294901760, %v83_v16  ;;  %46 = vperm.xlu1 %1546, %v28_v18   ;;  %v55_v61 = vld [vmem:[%s1723_s3] sm:$0xff] }
   0x8   :  { %v157_v20 = vand.u32 4294901760, %v1641_v15  ;;  %v86_v23 = vsel %vm75_vm0, %v54_v14, 0  ;;  %36 = vperm.xlu0 %1545, %v26_v17   ;;  %vm684_vm2 = vcmask 261120   ;;  %v56_v12 = vld [vmem:[%s1723_s3 + $0x8] sm:$0xff]  ;;  %s1584_s3 = smov [#allocation2]  }
   0x9   :  { %v20_v25 = vadd.s32 8, %v19_v19  ;;  %v71_v26 = vsub.s32 0, %v19_v19  ;;  %v166_v28 = vsub.f32 %v80_v13, %v1651_v21  ;;  %v1660_v29 = vand.u32 4294901760, %v86_v23  ;;  %s1226_s10 = sshll.u32 %s1584_s3, 4  ;;  %s1227_s10 = int_to_ptr.vmem [resolvable:$true] %s1226_s10 }
   0xa   :  { %v158_v24 = vsub.f32 %v1641_v15, %v157_v20  ;;  %v176_v31 = vsub.f32 %v83_v16, %v1653_v22  ;;  %v686_v62 = vsel %vm684_vm2, %v55_v61, 0  ;;  %v689_v19 = vsel %vm684_vm2, %v56_v12, 0  ;;  %s1559_s11 = scalar_lea.vmem %s1227_s10, 256  ;;  %p1564_p1 = scmp.lt.s32.totalorder %s1227_s10, %s1227_s10 }
   0xb   :  { %vm24_vm1 = vcmp.eq.s32.totalorder %v20_v25, 8  ;;  %v167_v34 = vand.u32 4294901760, %v166_v28  ;;  %v186_v35 = vsub.f32 %v86_v23, %v1660_v29  ;;  %v1683_v63 = vand.u32 4294901760, %v686_v62  ;;  %p1560_p0 = scmp.ne.s32.totalorder %s1227_s10, %s1559_s11  ;;  %p1565_p2 = scmp.lt.s32.totalorder %s1559_s11, %s1559_s11 }
   0xc   :  { %v159_v27 = vand.u32 4294901760, %v158_v24  ;;  %v1548_v30 = vpop.eup %1547  ;;  %v177_v37 = vand.u32 4294901760, %v176_v31 }
   0xd   :  { %v66_v32 = vmul.f32 -503.21954, %v1548_v30  ;;  %v168_v42 = vsub.f32 %v166_v28, %v167_v34  ;;  %v187_v43 = vand.u32 4294901760, %v186_v35  ;;  %v1686_v0 = vsub.f32 %v686_v62, %v1683_v63  ;;  %p1566_p3 = por %p1565_p2, %p1564_p1 }
   0xe   :  { %1313 = vmatprep.mubr.f32.mxu0 %v159_v27  ;;  %v178_v44 = vsub.f32 %v176_v31, %v177_v37 }
   0xf   :  { %v72_v33 = vrot.slane %v66_v32, %v71_v26  ;;  %v169_v49 = vand.u32 4294901760, %v168_v42  ;;  %v188_v50 = vsub.f32 %v186_v35, %v187_v43  ;;  %v762_v1 = vand.u32 4294901760, %v1686_v0  ;;  %p1567_p4 = pnand %p1566_p3, %p1560_p0 }
  0x10   :  { %v179_v52 = vand.u32 4294901760, %v178_v44 }
  0x11   :  { %v1550_v36 = vpop.eup %1549  ;;  %v74_v39 = vsel %vm24_vm1, %v72_v33, 0.0  ;;  %v189_v56 = vand.u32 4294901760, %v188_v50  ;;  %v763_v2 = vsub.f32 %v1686_v0, %v762_v1 }
  0x12   :  { %v62_v38 = vmul.f32 0.6931472, %v1550_v36  ;;  %v92_v40 = vand.u32 4294901760, %v74_v39 }
  0x13   :  { %v764_v3 = vand.u32 4294901760, %v763_v2 }
  0x14   :  { %v89_v41 = vand.u32 4294901760, %v62_v38  ;;  %v204_v45 = vsub.f32 %v74_v39, %v92_v40 }
  0x15   :  { %1377 = vmatprep.mubr.f32.mxu1 %v764_v3 }
  0x16   :  { %v1435_v46 = vpack.c.bf16 %v92_v40, %v89_v41  ;;  %v197_v47 = vsub.f32 %v62_v38, %v89_v41  ;;  %v205_v48 = vand.u32 4294901760, %v204_v45 }
  0x18   :  { %1436 = vmatprep.subr.bf16.mxu0 %v1435_v46  ;;  %v198_v51 = vand.u32 4294901760, %v197_v47  ;;  %v206_v53 = vsub.f32 %v204_v45, %v205_v48  ;;  %v1443_v59 = vpack.c.bf16 %v204_v45, %v197_v47 }
  0x19   :  { %1438 = vmatpush3.bf16.msra.mxu0 %v1435_v46 }
  0x1a   :  { %v199_v54 = vsub.f32 %v197_v47, %v198_v51  ;;  %v207_v55 = vand.u32 4294901760, %v206_v53  ;;  %v1451_v60 = vpack.c.bf16 %v205_v48, %v198_v51 }
  0x1c   :  { %1314 = vmatmul.mubr.f32.vlgmr.msra.gmra.mrb[0].mxu0 %v169_v49  ;;  %v200_v57 = vand.u32 4294901760, %v199_v54 }
  0x1d   :  { %1316 = vmatprep.mubr.f32.mxu0 %v179_v52 }
  0x1e   :  { %v1439_v58 = vpack.c.bf16 %v207_v55, %v200_v57 }
  0x20   :  { %1317 = vmatmul.mubr.f32.gmra.mrb[2].mxu0 %v189_v56  ;;  %1440 = vmatprep.subr.bf16.mxu0 %v1439_v58 }
  0x21   :  { %1442 = vmatpush3.bf16.msra.mxu0 %v1439_v58  ;;  %1323 = vmatprep.mubr.f32.mxu0 %v1628_v9 }
  0x22   :  { %1444 = vmatprep.subr.bf16.mxu0 %v1443_v59 }
  0x24   :  { %1324 = vmatmul.mubr.f32.vlgmr.msra.gmra.mrb[0].mxu0 %v1651_v21 }
  0x25   :  { %1326 = vmatprep.mubr.f32.mxu0 %v1653_v22  ;;  %1446 = vmatpush3.bf16.msra.mxu0 %v1443_v59 }
  0x26   :  { %1448 = vmatprep.subr.bf16.mxu0 %v1435_v46 }
  0x28   :  { %1327 = vmatmul.mubr.f32.gmra.mrb[2].mxu0 %v1660_v29 }
  0x29   :  { %1333 = vmatprep.mubr.f32.mxu0 %v1641_v15 }
  0x2c   :  { %1334 = vmatmul.mubr.f32.vlgmr.msra.gmra.mrb[0].mxu0 %v166_v28 }
  0x2d   :  { %1336 = vmatprep.mubr.f32.mxu0 %v176_v31  ;;  %1450 = vmatpush3.bf16.msra.mxu0 %v1435_v46 }
  0x2e   :  { %1452 = vmatprep.subr.bf16.mxu0 %v1451_v60 }
  0x30   :  { %1337 = vmatmul.mubr.f32.gmra.mrb[2].mxu0 %v186_v35 }
  0x31   :  { %1343 = vmatprep.mubr.f32.mxu0 %v157_v20 }
  0x34   :  { %1344 = vmatmul.mubr.f32.vlgmr.msra.gmra.mrb[0].mxu0 %v167_v34 }
  0x35   :  { %1346 = vmatprep.mubr.f32.mxu0 %v177_v37  ;;  %1454 = vmatpush3.bf16.msra.mxu0 %v1451_v60 }
  0x36   :  { %1456 = vmatprep.subr.bf16.mxu0 %v1435_v46 }
  0x38   :  { %1347 = vmatmul.mubr.f32.gmra.mrb[2].mxu0 %v187_v43 }
  0x39   :  { %1353 = vmatprep.mubr.f32.mxu0 %v1628_v9 }
  0x3c   :  { %1354 = vmatmul.mubr.f32.vlgmr.msra.gmra.mrb[0].mxu0 %v1651_v21 }
  0x3d   :  { %1356 = vmatprep.mubr.f32.mxu0 %v1653_v22  ;;  %1458 = vmatpush3.bf16.msra.mxu0 %v1435_v46 }
  0x40   :  { %1357 = vmatmul.mubr.f32.gmra.mrb[2].mxu0 %v1660_v29 }
  0x41   :  { %1363 = vmatprep.mubr.f32.mxu0 %v1628_v9 }
  0x44   :  { %1364 = vmatmul.mubr.f32.vlgmr.msra.gmra.mrb[0].mxu0 %v1651_v21 }
  0x45   :  { %1366 = vmatprep.mubr.f32.mxu0 %v1653_v22  ;;  %v1696_v22 = vand.u32 4294901760, %v689_v19 }
  0x47   :  { %v771_v23 = vsub.f32 %v689_v19, %v1696_v22 }
  0x48   :  { %1367 = vmatmul.mubr.f32.gmra.mrb[2].mxu0 %v1660_v29 }
  0x49   :  { %v772_v28 = vand.u32 4294901760, %v771_v23 }
  0x4b   :  { %v773_v37 = vsub.f32 %v771_v23, %v772_v28 }
  0x4d   :  { %v774_v48 = vand.u32 4294901760, %v773_v37 }
  0x82   :  { %v42_v5 = vpop.permute.xlu1 %41 }
  0x83   :  { %v32_v4 = vpop.permute.xlu0 %31 }
  0x86   :  { %v47_v14 = vpop.permute.xlu1 %46 }
  0x87   :  { %v37_v6 = vpop.permute.xlu0 %36 }
 0x117   :  { %v1365_v7 = vpop.f32.mrb[0].mxu0 }
 0x118   :  { %v1507_v8 = vadd.f32 %v1365_v7, %v37_v6  ;;  %v654_v9 = vpop.f32.mrb[1].mxu0 }
 0x119   :  { %v1508_v10 = vadd.f32 %v654_v9, %v32_v4 }
 0x11a   :  { %v678_v11 = vmul.f32 1.442695, %v1507_v8 }
 0x11b   :  { %v676_v13 = vmul.f32 1.442695, %v1508_v10  ;;  %v1368_v15 = vpop.f32.mrb[2].mxu0 }
 0x11c   :  { %1551 = vpow2.f32 %v678_v11  ;;  %v1509_v16 = vadd.f32 %v1368_v15, %v47_v14  ;;  %v666_v17 = vpop.f32.mrb[3].mxu0 }
 0x11d   :  { %1553 = vpow2.f32 %v676_v13  ;;  %v1510_v18 = vadd.f32 %v666_v17, %v42_v5 }
 0x11e   :  { %v682_v20 = vmul.f32 1.442695, %v1509_v16 }
 0x11f   :  { %v680_v21 = vmul.f32 1.442695, %v1510_v18 }
 0x120   :  { %1555 = vpow2.f32 %v682_v20 }
 0x121   :  { %1557 = vpow2.f32 %v680_v21 }
 0x126   :  { %v1552_v24 = vpop.eup %1551 }
 0x127   :  { %v1554_v25 = vpop.eup %1553  ;;  %v695_v26 = vand.u32 4294901760, %v1552_v24 }
 0x128   :  { %v692_v27 = vand.u32 4294901760, %v1554_v25 }
 0x129   :  { %v789_v29 = vsub.f32 %v1552_v24, %v695_v26 }
 0x12a   :  { %v1556_v30 = vpop.eup %1555  ;;  %v1459_v31 = vpack.c.bf16 %v695_v26, %v692_v27  ;;  %v782_v32 = vsub.f32 %v1554_v25, %v692_v27 }
 0x12b   :  { %v1558_v33 = vpop.eup %1557  ;;  %v701_v34 = vand.u32 4294901760, %v1556_v30  ;;  %v790_v35 = vand.u32 4294901760, %v789_v29 }
 0x12c   :  { %v698_v36 = vand.u32 4294901760, %v1558_v33  ;;  %1460 = vmatprep.subr.bf16.mxu1 %v1459_v31  ;;  %v783_v38 = vand.u32 4294901760, %v782_v32  ;;  %v1475_v39 = vpack.c.bf16 %v789_v29, %v782_v32 }
 0x12d   :  { %1462 = vmatpush3.bf16.msra.mxu1 %v1459_v31  ;;  %v791_v40 = vsub.f32 %v789_v29, %v790_v35  ;;  %v803_v41 = vsub.f32 %v1556_v30, %v701_v34 }
 0x12e   :  { %v1463_v42 = vpack.c.bf16 %v701_v34, %v698_v36  ;;  %v784_v43 = vsub.f32 %v782_v32, %v783_v38  ;;  %v796_v44 = vsub.f32 %v1558_v33, %v698_v36  ;;  %v1491_v45 = vpack.c.bf16 %v790_v35, %v783_v38 }
 0x12f   :  { %v792_v46 = vand.u32 4294901760, %v791_v40  ;;  %v804_v47 = vand.u32 4294901760, %v803_v41 }
 0x130   :  { %1464 = vmatprep.subr.bf16.mxu1 %v1463_v42  ;;  %v785_v49 = vand.u32 4294901760, %v784_v43  ;;  %v797_v50 = vand.u32 4294901760, %v796_v44  ;;  %v1479_v51 = vpack.c.bf16 %v803_v41, %v796_v44 }
 0x131   :  { %1466 = vmatpush3.bf16.msra.mxu1 %v1463_v42  ;;  %v805_v52 = vsub.f32 %v803_v41, %v804_v47 }
 0x132   :  { %v1467_v53 = vpack.c.bf16 %v792_v46, %v785_v49  ;;  %v798_v54 = vsub.f32 %v796_v44, %v797_v50  ;;  %v1495_v55 = vpack.c.bf16 %v804_v47, %v797_v50 }
 0x133   :  { %v806_v56 = vand.u32 4294901760, %v805_v52 }
 0x134   :  { %1378 = vmatmul.mubr.f32.vlgmr.msra.gmra.mrb[0].mxu1 %v774_v48  ;;  %1468 = vmatprep.subr.bf16.mxu1 %v1467_v53  ;;  %v799_v57 = vand.u32 4294901760, %v798_v54 }
 0x135   :  { %1470 = vmatpush3.bf16.msra.mxu1 %v1467_v53  ;;  %1388 = vmatprep.mubr.f32.mxu1 %v1683_v63 }
 0x136   :  { %v1471_v58 = vpack.c.bf16 %v806_v56, %v799_v57 }
 0x138   :  { %1472 = vmatprep.subr.bf16.mxu1 %v1471_v58 }
 0x139   :  { %1474 = vmatpush3.bf16.msra.mxu1 %v1471_v58 }
 0x13a   :  { %1476 = vmatprep.subr.bf16.mxu1 %v1475_v39 }
 0x13c   :  { %1389 = vmatmul.mubr.f32.vlgmr.msra.gmra.mrb[0].mxu1 %v1696_v22 }
 0x13d   :  { %1478 = vmatpush3.bf16.msra.mxu1 %v1475_v39  ;;  %1399 = vmatprep.mubr.f32.mxu1 %v1686_v0 }
 0x13e   :  { %1480 = vmatprep.subr.bf16.mxu1 %v1479_v51 }
 0x141   :  { %1482 = vmatpush3.bf16.msra.mxu1 %v1479_v51 }
 0x142   :  { %1484 = vmatprep.subr.bf16.mxu1 %v1459_v31 }
 0x144   :  { %1400 = vmatmul.mubr.f32.vlgmr.msra.gmra.mrb[0].mxu1 %v771_v23 }
 0x145   :  { %1486 = vmatpush3.bf16.msra.mxu1 %v1459_v31  ;;  %1410 = vmatprep.mubr.f32.mxu1 %v762_v1 }
 0x146   :  { %1488 = vmatprep.subr.bf16.mxu1 %v1463_v42 }
 0x149   :  { %1490 = vmatpush3.bf16.msra.mxu1 %v1463_v42 }
 0x14a   :  { %1492 = vmatprep.subr.bf16.mxu1 %v1491_v45 }
 0x14c   :  { %1411 = vmatmul.mubr.f32.vlgmr.msra.gmra.mrb[0].mxu1 %v772_v28 }
 0x14d   :  { %1494 = vmatpush3.bf16.msra.mxu1 %v1491_v45  ;;  %1421 = vmatprep.mubr.f32.mxu1 %v1683_v63 }
 0x14e   :  { %1496 = vmatprep.subr.bf16.mxu1 %v1495_v55 }
 0x151   :  { %1498 = vmatpush3.bf16.msra.mxu1 %v1495_v55 }
 0x152   :  { %1500 = vmatprep.subr.bf16.mxu1 %v1459_v31 }
 0x154   :  { %1422 = vmatmul.mubr.f32.vlgmr.msra.gmra.mrb[0].mxu1 %v1696_v22 }
 0x155   :  { %1502 = vmatpush3.bf16.msra.mxu1 %v1459_v31  ;;  %1432 = vmatprep.mubr.f32.mxu1 %v1683_v63 }
 0x156   :  { %1504 = vmatprep.subr.bf16.mxu1 %v1463_v42 }
 0x159   :  { %1506 = vmatpush3.bf16.msra.mxu1 %v1463_v42 }
 0x15c   :  { %1433 = vmatmul.mubr.f32.vlgmr.msra.gmra.mrb[0].mxu1 %v1696_v22 }
 0x22f   :  { %v1434_v59 = vpop.f32.mrb[0].mxu1 }
 0x230   :  { %1220 = vst [vmem:[#allocation2 + $0x8] sm:$0xff] %v1434_v59  ;;  %v1209_v60 = vpop.f32.mrb[1].mxu1 }
 0x231   :  { %1219 = vst [vmem:[#allocation2] sm:$0xff] %v1209_v60 }
 0x232   :  { %1570 = shalt.err (!%p1567_p4)
}
 0x233   :  { %s1571_s14 = scalar_lea.hbm %s1724_s4, 256 }
 0x234   :  { %p1572_p5 = scmp.ne.s32.totalorder %s1724_s4, %s1571_s14  ;;  %p1575_p6 = scmp.lt.u32.totalorder %s1571_s14, %s1724_s4 }
 0x236   :  { %p1577_p7 = pnand %p1575_p6, %p1572_p5 }
 0x238   :  { %1580 = shalt.err (!%p1577_p7)
}
 0x239   :  { %s1585_s19 = smov 128   ;;  %s1586_s20 = smov 8  }
 0x23a   :  { %1232 = dma.vmem_to_hbm [thread:$0]  %s1227_s10, 256, %s1724_s4, [#allocation3], %s1585_s19, %s1585_s19, %s1586_s20  }
 0x23b   :  { %1581 = dma.done.wait [#allocation3], 256  }
 0x23c   :  { %1582 = vsyncadd [#allocation3], 4294967040 }
 0x23d   :  { %1236 = vsyncpa [#allocation3], 1 }

</bundles_post_ra>
